<compile_context>
chip_gen: v7x
topology: tpu7x:2x2x1
jax: 0.10.0
libtpu: 0.0.40
codegen_flags: <defaults>
</compile_context>

<pallas_src>
import functools

import jax
import jax.numpy as jnp
import numpy as np
from jax.experimental import pallas as pl
from jax.experimental.pallas import tpu as pltpu


def _matmul_bias_kernel(a_ref, b_ref, bias_ref, o_ref, acc_ref):
    """Grid step (i, j, k): acc(i,j) += A(i,k) @ B(k,j); emit acc + bias at last k."""
    k = pl.program_id(2)

    @pl.when(k == 0)
    def _():
        acc_ref[...] = jnp.zeros_like(acc_ref)

    acc_ref[...] += jnp.dot(a_ref[...], b_ref[...],
                            preferred_element_type=jnp.float32)

    @pl.when(k == pl.num_programs(2) - 1)
    def _():
        o_ref[...] = (acc_ref[...] + bias_ref[...]).astype(o_ref.dtype)


def matmul_bias(a, b, bias, *, tm=128, tn=128, tk=128):
    """Computes a @ b + bias[None, :] with f32 MXU accumulation."""
    m, k = a.shape
    k2, n = b.shape
    assert k == k2, (a.shape, b.shape)
    tm, tn, tk = min(tm, m), min(tn, n), min(tk, k)
    assert m % tm == 0 and n % tn == 0 and k % tk == 0, (m, n, k, tm, tn, tk)

    bias2d = bias.reshape(1, n).astype(jnp.float32)
    grid = (m // tm, n // tn, k // tk)

    return pl.pallas_call(
        _matmul_bias_kernel,
        out_shape=jax.ShapeDtypeStruct((m, n), jnp.float32),
        grid_spec=pltpu.PrefetchScalarGridSpec(
            num_scalar_prefetch=0,
            grid=grid,
            in_specs=[
                pl.BlockSpec((tm, tk), lambda i, j, kk: (i, kk)),   # A row/K tile
                pl.BlockSpec((tk, tn), lambda i, j, kk: (kk, j)),   # B K/col tile
                pl.BlockSpec((1, tn), lambda i, j, kk: (0, j)),     # bias col tile
            ],
            out_specs=pl.BlockSpec((tm, tn), lambda i, j, kk: (i, j)),
            scratch_shapes=[pltpu.VMEM((tm, tn), jnp.float32)],
        ),
        compiler_params=pltpu.CompilerParams(
            dimension_semantics=("parallel", "parallel", "arbitrary"),
        ),
    )(a, b, bias2d)


def gcn_forward(x, adj, weights, biases):
    """Stacked GraphConvolution layers: h <- adj @ (h @ W) + b."""
    # TODO(synk): training-mode dropout (p=0.6) omitted; forward runs in eval
    # mode where nn.Dropout is the identity.
    h = x
    for w, b in zip(weights, biases):
        zero_bias = jnp.zeros((w.shape[1],), jnp.float32)
        support = matmul_bias(h, w, zero_bias)   # support = h @ W
        h = matmul_bias(adj, support, b)         # out = adj @ support + bias
        # The reference forward never applies self.activation, so no ELU here.
    return h


def _reference(x, adj, weights, biases):
    """Pure-JAX reference mirroring GCN.forward (eval-mode dropout)."""
    h = x
    hp = jax.lax.Precision.HIGHEST
    for w, b in zip(weights, biases):
        support = jnp.dot(h, w, precision=hp)
        h = jnp.dot(adj, support, precision=hp) + b
    return h


def _build_normalized_adj(key, n, p=0.05):
    """Symmetric random graph + self loops, D^-1/2 (A+I) D^-1/2 normalized."""
    a = (jax.random.uniform(key, (n, n)) < p).astype(jnp.float32)
    a = jnp.maximum(a, a.T)
    a = jnp.where(jnp.eye(n, dtype=bool), 1.0, a)
    deg = jnp.sum(a, axis=-1)
    d_inv_sqrt = 1.0 / jnp.sqrt(deg)
    return d_inv_sqrt[:, None] * a * d_inv_sqrt[None, :]


if __name__ == "__main__":
    N = 256                               # nodes (multiple of 128 -> lane-dense)
    FEATS = [128, 256, 128]               # num_features_per_layer (2 GCN layers)
    NUM_LAYERS = len(FEATS) - 1

    key = jax.random.PRNGKey(0)
    k_x, k_adj, *k_params = jax.random.split(key, 2 + 2 * NUM_LAYERS)

    x = jax.random.normal(k_x, (N, FEATS[0]), dtype=jnp.float32)
    adj = _build_normalized_adj(k_adj, N)

    weights, biases = [], []
    for li in range(NUM_LAYERS):
        fan_in, fan_out = FEATS[li], FEATS[li + 1]
        limit = float(np.sqrt(6.0 / (fan_in + fan_out)))        # xavier_uniform
        w = jax.random.uniform(k_params[2 * li], (fan_in, fan_out),
                               minval=-limit, maxval=limit, dtype=jnp.float32)
        b = 0.1 * jax.random.normal(k_params[2 * li + 1], (fan_out,),
                                    dtype=jnp.float32)
        weights.append(w)
        biases.append(b)

    out = gcn_forward(x, adj, weights, biases)
    out = jax.block_until_ready(out)

    ref = _reference(x, adj, weights, biases)
    assert out.shape == (N, FEATS[-1]), out.shape
    max_err = float(jnp.max(jnp.abs(out - ref)))
    assert np.allclose(np.asarray(out), np.asarray(ref), rtol=1e-3, atol=1e-3), max_err

    print("KERNEL_OK")
</pallas_src>

<mosaic_0001>
module attributes {stable_mosaic.version = 11 : i64} {
  func.func @_matmul_bias_kernel(%arg0: i32, %arg1: i32, %arg2: i32, %arg3: memref<128x128xf32, #tpu.memory_space<vmem>>, %arg4: memref<128x128xf32, #tpu.memory_space<vmem>>, %arg5: memref<1x128xf32, #tpu.memory_space<vmem>>, %arg6: memref<128x128xf32, #tpu.memory_space<vmem>>, %arg7: memref<128x128xf32, #tpu.memory_space<vmem>>) attributes {dimension_semantics = [#tpu.dimension_semantics<parallel>, #tpu.dimension_semantics<parallel>, #tpu.dimension_semantics<arbitrary>], iteration_bounds = array<i64: 2, 2, 1>, scalar_prefetch = 0 : i64, scratch_operands = 1 : i64, tpu.core_type = #tpu.core_type<tc>, window_params = [{transform_indices = @transform_0, window_bounds = array<i64: 128, 128>}, {transform_indices = @transform_1, window_bounds = array<i64: 128, 128>}, {transform_indices = @transform_2, window_bounds = array<i64: 1, 128>}, {transform_indices = @transform_3, window_bounds = array<i64: 128, 128>}]} {
    %c0_i32 = arith.constant 0 : i32
    %0 = arith.cmpi eq, %arg2, %c0_i32 : i32
    %1 = arith.extui %0 : i1 to i32
    %c0_i32_0 = arith.constant 0 : i32
    %2 = arith.cmpi ne, %1, %c0_i32_0 : i32
    scf.if %2 {
      %cst_10 = arith.constant 0.000000e+00 : f32
      %12 = vector.broadcast %cst_10 : f32 to vector<128x128xf32>
      %c0_11 = arith.constant 0 : index
      %c0_12 = arith.constant 0 : index
      %13 = vector.load %arg7[%c0_11, %c0_12] : memref<128x128xf32, #tpu.memory_space<vmem>>, vector<128x128xf32>
      tpu.vector_store %arg7[%c0_11, %c0_12], %12 {strides = array<i32>} : memref<128x128xf32, #tpu.memory_space<vmem>>, vector<128x128xf32>,
    } else {
    }
    %c0 = arith.constant 0 : index
    %c0_1 = arith.constant 0 : index
    %3 = vector.load %arg7[%c0, %c0_1] : memref<128x128xf32, #tpu.memory_space<vmem>>, vector<128x128xf32>
    %c0_2 = arith.constant 0 : index
    %c0_3 = arith.constant 0 : index
    %4 = vector.load %arg3[%c0_2, %c0_3] : memref<128x128xf32, #tpu.memory_space<vmem>>, vector<128x128xf32>
    %c0_4 = arith.constant 0 : index
    %c0_5 = arith.constant 0 : index
    %5 = vector.load %arg4[%c0_4, %c0_5] : memref<128x128xf32, #tpu.memory_space<vmem>>, vector<128x128xf32>
    %cst = arith.constant dense<0.000000e+00> : vector<128x128xf32>
    %6 = tpu.matmul %4, %5, %cst {dimension_numbers = #tpu.dot_dimension_numbers<[1], [0], [0], [1], [0, 0, 1, 1], [], []>} : vector<128x128xf32>, vector<128x128xf32>, vector<128x128xf32> -> vector<128x128xf32>
    %7 = arith.addf %3, %6 : vector<128x128xf32>
    %c0_6 = arith.constant 0 : index
    %c0_7 = arith.constant 0 : index
    %8 = vector.load %arg7[%c0_6, %c0_7] : memref<128x128xf32, #tpu.memory_space<vmem>>, vector<128x128xf32>
    tpu.vector_store %arg7[%c0_6, %c0_7], %7 {strides = array<i32>} : memref<128x128xf32, #tpu.memory_space<vmem>>, vector<128x128xf32>,
    %c0_i32_8 = arith.constant 0 : i32
    %9 = arith.cmpi eq, %arg2, %c0_i32_8 : i32
    %10 = arith.extui %9 : i1 to i32
    %c0_i32_9 = arith.constant 0 : i32
    %11 = arith.cmpi ne, %10, %c0_i32_9 : i32
    scf.if %11 {
      %c0_10 = arith.constant 0 : index
      %c0_11 = arith.constant 0 : index
      %12 = vector.load %arg7[%c0_10, %c0_11] : memref<128x128xf32, #tpu.memory_space<vmem>>, vector<128x128xf32>
      %c0_12 = arith.constant 0 : index
      %c0_13 = arith.constant 0 : index
      %13 = vector.load %arg5[%c0_12, %c0_13] : memref<1x128xf32, #tpu.memory_space<vmem>>, vector<1x128xf32>
      %14 = vector.broadcast %13 : vector<1x128xf32> to vector<128x128xf32>
      %15 = arith.addf %12, %14 : vector<128x128xf32>
      %c0_14 = arith.constant 0 : index
      %c0_15 = arith.constant 0 : index
      %16 = vector.load %arg6[%c0_14, %c0_15] : memref<128x128xf32, #tpu.memory_space<vmem>>, vector<128x128xf32>
      tpu.vector_store %arg6[%c0_14, %c0_15], %15 {strides = array<i32>} : memref<128x128xf32, #tpu.memory_space<vmem>>, vector<128x128xf32>,
    } else {
    }
    return
  }
  func.func @transform_0(%arg0: i32, %arg1: i32, %arg2: i32) -> (i32, i32) {
    %c0_i32 = arith.constant 0 : i32
    return %arg0, %arg2 : i32, i32
  }
  func.func @transform_1(%arg0: i32, %arg1: i32, %arg2: i32) -> (i32, i32) {
    %c0_i32 = arith.constant 0 : i32
    return %arg2, %arg1 : i32, i32
  }
  func.func @transform_2(%arg0: i32, %arg1: i32, %arg2: i32) -> (i32, i32) {
    %c0_i32 = arith.constant 0 : i32
    %c0_i32_0 = arith.constant 0 : i32
    return %c0_i32, %arg1 : i32, i32
  }
  func.func @transform_3(%arg0: i32, %arg1: i32, %arg2: i32) -> (i32, i32) {
    %c0_i32 = arith.constant 0 : i32
    return %arg0, %arg1 : i32, i32
  }
}

</mosaic_0001>

<bundles_post_ra>
// kernel: tpu_custom_call.1
= control target key start
LH: loop header
LB: loop body
LE: loop exit
PB: predicated region body
PF: predicated region fallthrough
CT: control target
= control target key end

     0   :  { %s1663_s0 = inlined_call_operand.hbm [shape: f32[256,128], index: 0, kind: input, shape index: {}]   ;;  %s1664_s1 = inlined_call_operand.hbm [shape: f32[128,256], index: 1, kind: input, shape index: {}]   ;;  %s1665_s2 = inlined_call_operand.vmem [shape: f32[1,256], index: 2, kind: input, shape index: {}]   ;;  %s1666_s3 = inlined_call_operand.hbm [shape: f32[256,256], index: 3, kind: output, shape index: {}]  }
   0x1   :  { %1680 = sst [smem:[#allocation18_spill]] %s1663_s0 }
   0x2   :  { %1681 = sst [smem:[#allocation19_spill]] %s1665_s2 }
   0x3   :  { %1682 = sst [smem:[#allocation20_spill]] %s1666_s3 }
   0x4   :  { %8 = vsyncpa [#allocation4], 0 }
   0x5   :  { %10 = vsyncpa [#allocation4 + $0x1], 0 }
   0x6   :  { %11 = vsyncpa [#allocation7], 0 }
   0x7   :  { %13 = vsyncpa [#allocation7 + $0x1], 0 }
   0x8   :  { %14 = vsyncpa [#allocation5], 0 }
   0x9   :  { %16 = vsyncpa [#allocation5 + $0x1], 0  ;;  %s1254_s12 = smov 0   ;;  %s1256_s13 = smov 0  }
   0xa   :  { %s1258_s14 = smov 0   ;;  %s1260_s15 = smov 0  }
   0xb   :  { %s1262_s16 = smov 0   ;;  %s1264_s17 = smov 0  }
   0xc   :  { %s1266_s18 = smov 0   ;;  %s1268_s19 = smov 0  }
   0xd   :  { %s1270_s20 = smov 0   ;;  %s1272_s21 = smov 0  }
   0xe   :  { %s1274_s22 = smov 0   ;;  %s1276_s23 = smov 0  }
   0xf   :  { %s1278_s24 = smov 0   ;;  %s1280_s25 = smov 0  }
  0x10 LB: > { %1683 = sst [smem:[#allocation12_spill]] %s1211_s22  ;;  %s718_s26 = sadd.s32 4294967295, %s1223_s25   ;;  %s1223_s25 = sphi %s1280_s25, %s22_s25   ;;  %s1219_s24 = sphi %s1278_s24, %s1719_s24   ;;  %s1215_s23 = sphi %s1276_s23, %s1730_s23   ;;  %s1211_s22 = sphi %s1274_s22, %s1717_s22   ;;  %s1207_s21 = sphi %s1272_s21, %s1729_s21   ;;  %s1203_s20 = sphi %s1270_s20, %s1728_s20   ;;  %s1199_s19 = sphi %s1268_s19, %s1727_s19   ;;  %s1195_s18 = sphi %s1266_s18, %s1726_s18   ;;  %s1191_s17 = sphi %s1264_s17, %s1725_s17   ;;  %s1187_s16 = sphi %s1262_s16, %s1724_s16   ;;  %s1183_s15 = sphi %s1260_s15, %s1723_s15   ;;  %s1179_s14 = sphi %s1258_s14, %s1722_s14   ;;  %s1175_s13 = sphi %s1256_s13, %s1721_s13   ;;  %s1171_s12 = sphi %s1254_s12, %s1720_s12  }
  0x11   : > { %1684 = sst [smem:[#allocation13_spill]] %s1219_s24  ;;  %p57_p0 = scmp.ne.s32.totalorder %s1203_s20, %s1199_s19 }
  0x12   : > { %p1668_p1 = scmp.eq.s32.totalorder %s1223_s25, 0  ;;  %p63_p2 = scmp.ne.s32.totalorder %s1199_s19, %s1195_s18 }
  0x13   : > { %p1329_p3 = scmp.eq.s32.totalorder %s718_s26, 0  ;;  %p1333_p4 = scmp.eq.s32.totalorder %s718_s26, 3 }
  0x14   : > { %p59_p5 = por %p1668_p1, %p57_p0  ;;  %p1667_p7 = scmp.lt.s32.totalorder %s1223_s25, 4 }
  0x15   : > { %s1686_s30 = scalar_select %p1333_p4, 1, 0 }
  0x16   : > { %p1341_p6 = por %p1329_p3, %p63_p2  ;;  %s169_s5 = sand.u32 1, %s1203_s20  }
  0x17   : > { %s738_s6 = sshll.u32 %s1219_s24, 11  ;;  %s722_s7 = sshll.u32 %s169_s5, 7 }
  0x18   : > { %s1687_s4 = scalar_select %p1341_p6, 1, 0 }
  0x19   : > { %s1688_s0 = sld [smem:[#allocation18_spill]]  ;;  %s173_s11 = scalar_lea.vmem [#allocation3], %s722_s7 }
  0x1a   : > { %s181_s18 = sshll.u32 %s173_s11, 4  ;;  %p1355_p8 = pnand %p1667_p7, %p59_p5  ;;  %s1359_s18 = int_to_ptr.vmem [resolvable:$true] %s181_s18 }
  0x1b   : > { %s1361_s28 = scalar_lea.sflag [#allocation4], %s169_s5 }
  0x1c   : > { %p1015_p10 = pneg %p1355_p8 }
  0x1f   : > { %s1351_s10 = scalar_lea.hbm %s1688_s0, %s738_s6  ;;  %s1018_s9 = scalar_lea.hbm %s1688_s0, 4096 }
  0x20   : > { %s1013_s8 = scalar_lea.hbm %s1351_s10, 2048  ;;  %p1019_p13 = scmp.lt.u32.totalorder %s1351_s10, %s1688_s0 }
  0x21   : > { %p1014_p9 = scmp.ne.s32.totalorder %s1351_s10, %s1013_s8  ;;  %p1020_p0 = scmp.lt.u32.totalorder %s1018_s9, %s1013_s8 }
  0x22   : > { %p1022_p5 = scmp.lt.u32.totalorder %s1013_s8, %s1351_s10 }
  0x23   : > { %p1016_p11 = pnand %p1015_p10, %p1014_p9  ;;  %p1021_p2 = por %p1020_p0, %p1019_p13 }
  0x25   : > { %p1017_p12 = pneg %p1016_p11  ;;  %p1023_p7 = por %p1022_p5, %p1021_p2 }
  0x27   : > { %p1024_p1 = pnand %p1023_p7, %p1017_p12 }
  0x29   : > { %1027 = shalt.err (!%p1024_p1)
}
  0x2a   : > { %s1028_s5 = scalar_lea.vmem %s1359_s18, 2048  ;;  %s1225_s6 = smov [#allocation3]  }
  0x2b   : > { %p1029_p9 = scmp.ne.s32.totalorder %s1359_s18, %s1028_s5  ;;  %s1033_s7 = sshll.u32 %s1225_s6, 4  ;;  %s1034_s7 = int_to_ptr.vmem [resolvable:$false] %s1033_s7 }
  0x2c   : > { %s1035_s27 = scalar_lea.vmem %s1034_s7, 4096  ;;  %p1036_p4 = scmp.lt.s32.totalorder %s1359_s18, %s1034_s7 }
  0x2d   : > { %p1031_p11 = pnand %p1029_p9, %p1015_p10  ;;  %p1037_p13 = scmp.lt.s32.totalorder %s1035_s27, %s1028_s5 }
  0x2f   : > { %p1032_p6 = pneg %p1031_p11  ;;  %p1038_p0 = por %p1037_p13, %p1036_p4 }
  0x31   : > { %p1039_p2 = pnand %p1038_p0, %p1032_p6 }
  0x33   : > { %1042 = shalt.err (!%p1039_p2)
}
  0x34   : > { %s1670_s8 = smov 128   ;;  %s1671_s9 = smov 8  }
  0x35   : > { %885 = dma.hbm_to_vmem [thread:$0]  (!%p1355_p8), %s1351_s10, 2048, %s1359_s18, %s1361_s28, %s1670_s8, %s1670_s8, %s1671_s9  }
  0x36   : > { %p727_p1 = scmp.ge.s32.totalorder %s1223_s25, 1  ;;  %p218_p4 = scmp.lt.s32.totalorder %s1223_s25, 5 }
  0x37   : > { %s719_s5 = sadd.s32 4294967294, %s1223_s25   ;;  %s37_s6 = sadd.s32 1, %s1215_s23 }
  0x38   : > { %p1394_p6 = pnand %p727_p1, %p218_p4  ;;  %s78_s7 = sadd.s32 1, %s1191_s17 }
  0x39   : > { %p39_p7 = scmp.ge.s32.totalorder %s37_s6, 2  ;;  %p85_p10 = scmp.ne.s32.totalorder %s1191_s17, %s1187_s16 }
  0x3a   : > { %p91_p12 = scmp.ne.s32.totalorder %s1187_s16, %s1183_s15  ;;  %s132_s26 = sadd.s32 1, %s1179_s14 }
  0x3b   : > { %s1732_s6 = smov (%p39_p7, %s37_s6), 0  ;;  %s1692_s28 = sadd.s32 1, %s1219_s24 }
  0x3c   : > { %1691 = sst [smem:[#allocation14_spill]] %s1732_s6  ;;  %s1734_s28 = smov (!%p39_p7, %s1692_s28), %s1219_s24 }
  0x3d   : > { %s74_s10 = ssub.s32 %s1215_s23, %s1732_s6  ;;  %p1693_p8 = scmp.eq.s32.totalorder %s1223_s25, 0 }
  0x3e   : > { %p43_p9 = scmp.ge.s32.totalorder %s1734_s28, 2  ;;  %p76_p11 = scmp.eq.s32.totalorder %s74_s10, 0 }
  0x3f   : > { %p1415_p5 = por %p85_p10, %p1693_p8  ;;  %p1421_p13 = por %p91_p12, %p1329_p3 }
  0x40   : > { %p142_p0 = scmp.ne.s32.totalorder %s1179_s14, %s1175_s13  ;;  %s1736_s28 = smov (%p43_p9, %s1734_s28), 0 }
  0x41   : > { %s1695_s15 = scalar_select %p1421_p13, 1, 0 }
  0x42   : > { %1696 = sst [smem:[#allocation15_spill]] %s1736_s28  ;;  %s45_s8 = ssub.s32 %s1219_s24, %s1736_s28 }
  0x43   : > { %s1430_s27 = scalar_select %p76_p11, %s1191_s17, %s78_s7  }
  0x44   : > { %p1698_p2 = scmp.ne.s32.totalorder %s1686_s30, 0  ;;  %p48_p4 = scmp.eq.s32.totalorder %s45_s8, 0 }
  0x45   : > { %1697 = sst [smem:[#allocation16_spill]] %s1430_s27  ;;  %s129_s29 = sor.u32 %s74_s10, %s45_s8 }
  0x46   : > { %p1436_p1 = por %p1698_p2, %p142_p0  ;;  %p130_p3 = scmp.eq.s32.totalorder %s129_s29, 0 }
  0x47   : > { %p148_p7 = scmp.ne.s32.totalorder %s1175_s13, %s1171_s12  ;;  %s1701_s0 = sadd.s32 1, %s1203_s20 }
  0x48   : > { %s1699_s9 = scalar_select %p1436_p1, 1, 0 }
  0x49   : > { %s1445_s6 = scalar_select %p48_p4, %s1203_s20, %s1701_s0  }
  0x4a   : > { %1700 = sst [smem:[#allocation17_spill]] %s1699_s9  ;;  %p149_p10 = scmp.eq.s32.totalorder %s719_s5, 3 }
  0x4b   : > { %s1448_s3 = scalar_select %p130_p3, %s1179_s14, %s132_s26  }
  0x4c   : > { %s191_s7 = sand.u32 1, %s1191_s17   ;;  %p1451_p12 = por %p149_p10, %p148_p7 }
  0x4d   : > { %s725_s27 = sshll.u32 %s191_s7, 7  ;;  %s726_s28 = sshll.u32 %s1215_s23, 7 }
  0x4e   : > { %s1702_s30 = scalar_select %p1451_p12, 1, 0 }
  0x4f   : > { %s195_s24 = scalar_lea.vmem [#allocation6], %s725_s27  ;;  %s1459_s8 = scalar_lea.hbm %s1664_s1, %s726_s28 }
  0x50   : > { %s204_s9 = sshll.u32 %s195_s24, 4  ;;  %p1703_p8 = scmp.lt.s32.totalorder %s1223_s25, 4  ;;  %s1461_s9 = int_to_ptr.vmem [resolvable:$true] %s204_s9 }
  0x51   : > { %s1471_s24 = scalar_lea.sflag [#allocation7], %s191_s7  ;;  %s1043_s5 = scalar_lea.hbm %s1459_s8, 2048 }
  0x52   : > { %p1467_p9 = pnand %p1703_p8, %p1415_p5  ;;  %p1044_p11 = scmp.ne.s32.totalorder %s1459_s8, %s1043_s5 }
  0x53   : > { %s1048_s26 = scalar_lea.hbm %s1664_s1, 4096  ;;  %p1049_p5 = scmp.lt.u32.totalorder %s1459_s8, %s1664_s1 }
  0x54   : > { %p1045_p0 = pneg %p1467_p9  ;;  %p1050_p3 = scmp.lt.u32.totalorder %s1048_s26, %s1043_s5 }
  0x55   : > { %p1052_p10 = scmp.lt.u32.totalorder %s1043_s5, %s1459_s8 }
  0x56   : > { %p1046_p2 = pnand %p1045_p0, %p1044_p11  ;;  %p1051_p7 = por %p1050_p3, %p1049_p5 }
  0x58   : > { %p1047_p4 = pneg %p1046_p2  ;;  %p1053_p8 = por %p1052_p10, %p1051_p7 }
  0x5a   : > { %p1054_p12 = pnand %p1053_p8, %p1047_p4 }
  0x5c   : > { %1057 = shalt.err (!%p1054_p12)
}
  0x5d   : > { %s1058_s18 = scalar_lea.vmem %s1461_s9, 2048  ;;  %s1228_s27 = smov [#allocation6]  }
  0x5e   : > { %p1059_p11 = scmp.ne.s32.totalorder %s1461_s9, %s1058_s18  ;;  %s1063_s29 = sshll.u32 %s1228_s27, 4  ;;  %s1064_s29 = int_to_ptr.vmem [resolvable:$false] %s1063_s29 }
  0x5f   : > { %s1065_s7 = scalar_lea.vmem %s1064_s29, 4096  ;;  %p1066_p13 = scmp.lt.s32.totalorder %s1461_s9, %s1064_s29 }
  0x60   : > { %p1061_p2 = pnand %p1059_p11, %p1045_p0  ;;  %p1067_p5 = scmp.lt.s32.totalorder %s1065_s7, %s1058_s18 }
  0x62   : > { %p1062_p1 = pneg %p1061_p2  ;;  %p1068_p3 = por %p1067_p5, %p1066_p13 }
  0x64   : > { %p1069_p7 = pnand %p1068_p3, %p1062_p1 }
  0x66   : > { %1072 = shalt.err (!%p1069_p7)
}
  0x67   : > { %s1229_s5 = smov 256   ;;  %s1705_s2 = smov 8  }
  0x68   : > { %s1706_s22 = smov 128   ;;  %222 = sbr.rel (%p1394_p6) target bundleno = 394 (0x18a), region = 32 }
  0x69   : > { %888 = dma.hbm_to_vmem [thread:$0]  (!%p1467_p9), %s1459_s8, 2048, %s1461_s9, %s1471_s24, %s1229_s5, %s1706_s22, %s1705_s2  }
  0x6a   : > { %s224_s26 = sand.u32 (!%p1394_p6), 1, %s1199_s19   ;;  %p1707_p13 = scmp.ne.s32.totalorder (!%p1394_p6), %s1687_s4, 0 }
  0x6b   : > { %s728_s28 = sshll.u32 (!%p1394_p6), %s224_s26, 7  ;;  %s225_s10 = scalar_lea.sflag (!%p1394_p6), [#allocation4], %s224_s26 }
  0x6c   : > { %s1504_s18 = scalar_lea.vmem (!%p1394_p6), [#allocation3], %s728_s28 }
  0x6f   : > { %1158 = dma.done.wait (%p1707_p13), %s225_s10, 2048  }
  0x70   : > { %1160 = vsyncadd (%p1707_p13), %s225_s10, 4294965248  ;;  %s233_s0 = sand.u32 1, %s1187_s16   ;;  %p1708_p6 = scmp.ne.s32.totalorder %s1695_s15, 0 }
  0x71   : > { %s729_s27 = sshll.u32 %s233_s0, 7  ;;  %s234_s9 = scalar_lea.sflag [#allocation7], %s233_s0 }
  0x72   : > { %s1511_s8 = scalar_lea.vmem [#allocation6], %s729_s27 }
  0x73   : > { %1162 = dma.done.wait (%p1708_p6), %s234_s9, 2048  }
  0x74   : > { %1164 = vsyncadd (%p1708_p6), %s234_s9, 4294965248  ;;  %v326_v0 = vld [vmem:[%s1511_s8] sm:$0xff]  ;;  %v327_v1 = vld [vmem:[%s1511_s8 + $0x8] sm:$0xff]  ;;  %p270_p1 = scmp.lt.s32.totalorder %s1207_s21, 1  ;;  %s1709_s11 = sld [smem:[#allocation12_spill]] }
  0x75   : > { %v328_v2 = vld [vmem:[%s1511_s8 + $0x10] sm:$0xff]  ;;  %v828_v3 = vpack.c.bf16 %v327_v1, %v326_v0  ;;  %v329_v4 = vld [vmem:[%s1511_s8 + $0x18] sm:$0xff]  ;;  %v330_v6 = vld [vmem:[%s1511_s8 + $0x20] sm:$0xff]  ;;  %s265_s15 = sand.u32 1, %s1175_s13   ;;  %s1710_s7 = sld [smem:[#allocation19_spill]] }
  0x76   : > { %v832_v5 = vpack.c.bf16 %v329_v4, %v328_v2  ;;  %v331_v7 = vld [vmem:[%s1511_s8 + $0x28] sm:$0xff]  ;;  %v310_v9 = vld [vmem:[%s1504_s18] sm:$0xff]  ;;  %v332_v11 = vld [vmem:[%s1511_s8 + $0x30] sm:$0xff]  ;;  %s271_s4 = scalar_select %p270_p1, %s1207_s21, 1 }
  0x77   : > { %829 = vmatprep.subr.bf16.mxu0 %v828_v3  ;;  %860 = vmatprep.subr.bf16.mxu1 %v828_v3  ;;  %v836_v8 = vpack.c.bf16 %v331_v7, %v330_v6  ;;  %v318_v10 = vld [vmem:[%s1504_s18 + $0x40] sm:$0xff]  ;;  %v333_v12 = vld [vmem:[%s1511_s8 + $0x38] sm:$0xff]  ;;  %v335_v15 = vld [vmem:[%s1511_s8 + $0x48] sm:$0xff]  ;;  %s730_s2 = sshll.u32 %s265_s15, 7  ;;  %s1711_s27 = sld [smem:[#allocation20_spill]] }
  0x78   : > { %831 = vmatpush3.bf16.msra.mxu0 %v828_v3  ;;  %868 = vmatpush3.bf16.msra.mxu1 %v828_v3  ;;  %v840_v13 = vpack.c.bf16 %v333_v12, %v332_v11  ;;  %v334_v14 = vld [vmem:[%s1511_s8 + $0x40] sm:$0xff]  ;;  %v336_v17 = vld [vmem:[%s1511_s8 + $0x50] sm:$0xff]  ;;  %v337_v18 = vld [vmem:[%s1511_s8 + $0x58] sm:$0xff]  ;;  %s1557_s22 = scalar_lea.vmem [#allocation8], %s730_s2  ;;  %s1712_s9 = sld [smem:[#allocation17_spill]] }
  0x79   : > { %833 = vmatprep.subr.bf16.mxu0 %v832_v5  ;;  %861 = vmatprep.subr.bf16.mxu1 %v832_v5  ;;  %v844_v16 = vpack.c.bf16 %v335_v15, %v334_v14  ;;  %v848_v19 = vpack.c.bf16 %v337_v18, %v336_v17  ;;  %v338_v20 = vld [vmem:[%s1511_s8 + $0x60] sm:$0xff]  ;;  %v339_v21 = vld [vmem:[%s1511_s8 + $0x68] sm:$0xff]  ;;  %v340_v23 = vld [vmem:[%s1511_s8 + $0x70] sm:$0xff]  ;;  %s1230_s24 = smov [#allocation8]  }
  0x7a   : > { %804 = vmatprep.mubr.f32.mxu0 %v310_v9  ;;  %816 = vmatprep.mubr.f32.mxu1 %v318_v10  ;;  %v852_v22 = vpack.c.bf16 %v339_v21, %v338_v20  ;;  %v341_v24 = vld [vmem:[%s1511_s8 + $0x78] sm:$0xff]  ;;  %v311_v26 = vld [vmem:[%s1504_s18 + $0x8] sm:$0xff]  ;;  %v312_v28 = vld [vmem:[%s1504_s18 + $0x10] sm:$0xff]  ;;  %s739_s26 = sshll.u32 %s1709_s11, 5  ;;  %s1077_s29 = sshll.u32 %s1230_s24, 4  ;;  %s1078_s29 = int_to_ptr.vmem [resolvable:$false] %s1077_s29 }
  0x7b   : > { %v856_v25 = vpack.c.bf16 %v341_v24, %v340_v23  ;;  %v319_v27 = vld [vmem:[%s1504_s18 + $0x48] sm:$0xff]  ;;  %v320_v29 = vld [vmem:[%s1504_s18 + $0x50] sm:$0xff]  ;;  %v313_v30 = vld [vmem:[%s1504_s18 + $0x18] sm:$0xff]  ;;  %s272_s5 = scalar_lea.vmem %s1710_s7, %s271_s4  ;;  %s590_s28 = sadd.s32 %s1207_s21, %s739_s26 }
  0x7c   : > { %835 = vmatpush3.bf16.msra.mxu0 %v832_v5  ;;  %869 = vmatpush3.bf16.msra.mxu1 %v832_v5  ;;  %v321_v31 = vld [vmem:[%s1504_s18 + $0x58] sm:$0xff]  ;;  %v314_v32 = vld [vmem:[%s1504_s18 + $0x20] sm:$0xff]  ;;  %v315_v34 = vld [vmem:[%s1504_s18 + $0x28] sm:$0xff]  ;;  %s735_s10 = sshll.u32 %s590_s28, 7  ;;  %s1587_s4 = scalar_lea.sflag [#allocation5], %s265_s15 }
  0x7d   : > { %837 = vmatprep.subr.bf16.mxu0 %v836_v8  ;;  %862 = vmatprep.subr.bf16.mxu1 %v836_v8  ;;  %v322_v33 = vld [vmem:[%s1504_s18 + $0x60] sm:$0xff]  ;;  %v323_v35 = vld [vmem:[%s1504_s18 + $0x68] sm:$0xff]  ;;  %v316_v36 = vld [vmem:[%s1504_s18 + $0x30] sm:$0xff]  ;;  %s1577_s8 = scalar_lea.hbm %s1711_s27, %s735_s10  ;;  %s1079_s7 = scalar_lea.vmem %s1078_s29, 4096 }
  0x7e   : > { %v324_v37 = vld [vmem:[%s1504_s18 + $0x70] sm:$0xff]  ;;  %v317_v38 = vld [vmem:[%s1504_s18 + $0x38] sm:$0xff]  ;;  %v731_v40 = vld [vmem:[%s272_s5] ss:$0 sm:$0xff]  ;;  %p1713_p9 = scmp.ne.s32.totalorder %s1712_s9, 0 }
  0x7f   : > { %v325_v39 = vld [vmem:[%s1504_s18 + $0x78] sm:$0xff]  ;;  %s593_s18 = sshll.u32 %s1557_s22, 4  ;;  %s1579_s18 = int_to_ptr.vmem [resolvable:$true] %s593_s18 }
  0x80   : > { %839 = vmatpush3.bf16.msra.mxu0 %v836_v8  ;;  %870 = vmatpush3.bf16.msra.mxu1 %v836_v8  ;;  %s1073_s11 = scalar_lea.vmem %s1579_s18, 2048  ;;  %p1080_p10 = scmp.lt.s32.totalorder %s1579_s18, %s1078_s29 }
  0x81   : > { %841 = vmatprep.subr.bf16.mxu0 %v840_v13  ;;  %863 = vmatprep.subr.bf16.mxu1 %v840_v13  ;;  %p1074_p12 = scmp.ne.s32.totalorder %s1579_s18, %s1073_s11  ;;  %p1081_p8 = scmp.lt.s32.totalorder %s1079_s7, %s1073_s11 }
  0x83   : > { %p1075_p0 = pnand %p1074_p12, %p1713_p9  ;;  %p1082_p11 = por %p1081_p8, %p1080_p10 }
  0x84   : > { %843 = vmatpush3.bf16.msra.mxu0 %v840_v13  ;;  %871 = vmatpush3.bf16.msra.mxu1 %v840_v13 }
  0x85   : > { %845 = vmatprep.subr.bf16.mxu0 %v844_v16  ;;  %864 = vmatprep.subr.bf16.mxu1 %v844_v16  ;;  %p1076_p4 = pneg %p1075_p0 }
  0x87   : > { %p1083_p2 = pnand %p1082_p11, %p1076_p4 }
  0x88   : > { %847 = vmatpush3.bf16.msra.mxu0 %v844_v16  ;;  %872 = vmatpush3.bf16.msra.mxu1 %v844_v16 }
  0x89   : > { %849 = vmatprep.subr.bf16.mxu0 %v848_v19  ;;  %865 = vmatprep.subr.bf16.mxu1 %v848_v19 }
  0x8c   : > { %851 = vmatpush3.bf16.msra.mxu0 %v848_v19  ;;  %873 = vmatpush3.bf16.msra.mxu1 %v848_v19 }
  0x8d   : > { %853 = vmatprep.subr.bf16.mxu0 %v852_v22  ;;  %866 = vmatprep.subr.bf16.mxu1 %v852_v22 }
  0x90   : > { %855 = vmatpush3.bf16.msra.mxu0 %v852_v22  ;;  %874 = vmatpush3.bf16.msra.mxu1 %v852_v22 }
  0x91   : > { %857 = vmatprep.subr.bf16.mxu0 %v856_v25  ;;  %867 = vmatprep.subr.bf16.mxu1 %v856_v25 }
  0x94   : > { %859 = vmatpush3.bf16.msra.mxu0 %v856_v25  ;;  %875 = vmatpush3.bf16.msra.mxu1 %v856_v25 }
  0x97   : > { %805 = vmatmul.mubr.f32.vlgmr.msra.gmra.mrb[0].mxu0 %v311_v26  ;;  %817 = vmatmul.mubr.f32.vlgmr.msra.gmra.mrb[0].mxu1 %v319_v27 }
  0x98   : > { %807 = vmatprep.mubr.f32.mxu0 %v312_v28  ;;  %819 = vmatprep.mubr.f32.mxu1 %v320_v29 }
  0x9b   : > { %808 = vmatmul.mubr.f32.gmra.mrb[2].mxu0 %v313_v30  ;;  %820 = vmatmul.mubr.f32.gmra.mrb[2].mxu1 %v321_v31 }
  0x9c   : > { %810 = vmatprep.mubr.f32.mxu0 %v314_v32  ;;  %822 = vmatprep.mubr.f32.mxu1 %v322_v33 }
  0x9f   : > { %811 = vmatmul.mubr.f32.gmra.mrb[4].mxu0 %v315_v34  ;;  %823 = vmatmul.mubr.f32.gmra.mrb[4].mxu1 %v323_v35 }
  0xa0   : > { %813 = vmatprep.mubr.f32.mxu0 %v316_v36  ;;  %825 = vmatprep.mubr.f32.mxu1 %v324_v37 }
  0xa3   : > { %814 = vmatmul.mubr.f32.gmra.mrb[6].mxu0 %v317_v38  ;;  %826 = vmatmul.mubr.f32.gmra.mrb[6].mxu1 %v325_v39 }
 0x16a   : > { %v806_v41 = vpop.f32.mrb[0].mxu0  ;;  %v818_v42 = vpop.f32.mrb[0].mxu1 }
 0x16b   : > { %v546_v43 = vadd.f32 %v806_v41, %v731_v40  ;;  %v554_v44 = vadd.f32 %v818_v42, %v731_v40  ;;  %v408_v45 = vpop.f32.mrb[1].mxu0  ;;  %v448_v46 = vpop.f32.mrb[1].mxu1 }
 0x16c   : > { %v545_v47 = vadd.f32 %v731_v40, %v408_v45  ;;  %v553_v48 = vadd.f32 %v731_v40, %v448_v46 }
 0x16d   : > { %562 = vst [vmem:[%s1557_s22 + $0x8] sm:$0xff] %v546_v43  ;;  %570 = vst [vmem:[%s1557_s22 + $0x48] sm:$0xff] %v554_v44 }
 0x16e   : > { %561 = vst [vmem:[%s1557_s22] sm:$0xff] %v545_v47  ;;  %569 = vst [vmem:[%s1557_s22 + $0x40] sm:$0xff] %v553_v48  ;;  %v809_v49 = vpop.f32.mrb[2].mxu0  ;;  %v821_v50 = vpop.f32.mrb[2].mxu1 }
 0x16f   : > { %v548_v51 = vadd.f32 %v809_v49, %v731_v40  ;;  %v556_v52 = vadd.f32 %v821_v50, %v731_v40  ;;  %v418_v53 = vpop.f32.mrb[3].mxu0  ;;  %v458_v54 = vpop.f32.mrb[3].mxu1 }
 0x170   : > { %v547_v55 = vadd.f32 %v731_v40, %v418_v53  ;;  %v555_v56 = vadd.f32 %v731_v40, %v458_v54 }
 0x171   : > { %564 = vst [vmem:[%s1557_s22 + $0x18] sm:$0xff] %v548_v51  ;;  %572 = vst [vmem:[%s1557_s22 + $0x58] sm:$0xff] %v556_v52 }
 0x172   : > { %563 = vst [vmem:[%s1557_s22 + $0x10] sm:$0xff] %v547_v55  ;;  %571 = vst [vmem:[%s1557_s22 + $0x50] sm:$0xff] %v555_v56  ;;  %v812_v57 = vpop.f32.mrb[4].mxu0  ;;  %v824_v58 = vpop.f32.mrb[4].mxu1 }
 0x173   : > { %v550_v59 = vadd.f32 %v812_v57, %v731_v40  ;;  %v558_v60 = vadd.f32 %v824_v58, %v731_v40  ;;  %v428_v61 = vpop.f32.mrb[5].mxu0  ;;  %v468_v62 = vpop.f32.mrb[5].mxu1 }
 0x174   : > { %v549_v63 = vadd.f32 %v731_v40, %v428_v61  ;;  %v557_v0 = vadd.f32 %v731_v40, %v468_v62 }
 0x175   : > { %566 = vst [vmem:[%s1557_s22 + $0x28] sm:$0xff] %v550_v59  ;;  %574 = vst [vmem:[%s1557_s22 + $0x68] sm:$0xff] %v558_v60 }
 0x176   : > { %565 = vst [vmem:[%s1557_s22 + $0x20] sm:$0xff] %v549_v63  ;;  %573 = vst [vmem:[%s1557_s22 + $0x60] sm:$0xff] %v557_v0  ;;  %v815_v1 = vpop.f32.mrb[6].mxu0  ;;  %v827_v2 = vpop.f32.mrb[6].mxu1 }
 0x177   : > { %v552_v3 = vadd.f32 %v815_v1, %v731_v40  ;;  %v560_v4 = vadd.f32 %v827_v2, %v731_v40  ;;  %v438_v5 = vpop.f32.mrb[7].mxu0  ;;  %v478_v6 = vpop.f32.mrb[7].mxu1 }
 0x178   : > { %v551_v7 = vadd.f32 %v731_v40, %v438_v5  ;;  %v559_v8 = vadd.f32 %v731_v40, %v478_v6 }
 0x179   : > { %568 = vst [vmem:[%s1557_s22 + $0x38] sm:$0xff] %v552_v3  ;;  %576 = vst [vmem:[%s1557_s22 + $0x78] sm:$0xff] %v560_v4 }
 0x17a   : > { %567 = vst [vmem:[%s1557_s22 + $0x30] sm:$0xff] %v551_v7  ;;  %575 = vst [vmem:[%s1557_s22 + $0x70] sm:$0xff] %v559_v8 }
 0x17b   : > { %1086 = shalt.err (!%p1083_p2)
}
 0x17c   : > { %s1087_s15 = scalar_lea.hbm %s1577_s8, 2048  ;;  %s1091_s22 = scalar_lea.hbm %s1711_s27, 8192 }
 0x17d   : > { %p1088_p5 = scmp.ne.s32.totalorder %s1577_s8, %s1087_s15  ;;  %p1092_p13 = scmp.lt.u32.totalorder %s1577_s8, %s1711_s27 }
 0x17e   : > { %p1093_p6 = scmp.lt.u32.totalorder %s1091_s22, %s1087_s15  ;;  %p1095_p12 = scmp.lt.u32.totalorder %s1087_s15, %s1577_s8 }
 0x17f   : > { %p1089_p3 = pnand %p1088_p5, %p1713_p9 }
 0x180   : > { %p1094_p1 = por %p1093_p6, %p1092_p13 }
 0x181   : > { %p1090_p7 = pneg %p1089_p3 }
 0x182   : > { %p1096_p0 = por %p1095_p12, %p1094_p1 }
 0x184   : > { %p1097_p4 = pnand %p1096_p0, %p1090_p7 }
 0x186   : > { %1100 = shalt.err (!%p1097_p4)
}
 0x187   : > { %s1231_s10 = smov 128   ;;  %s1232_s21 = smov 256  }
 0x188   : > { %s1233_s0 = smov 8  }
 0x189   : > { %880 = dma.vmem_to_hbm [thread:$0]  (%p1713_p9), %s1579_s18, 2048, %s1577_s8, %s1587_s4, %s1231_s10, %s1232_s21, %s1233_s0  }
 0x18a PF: > { %p894_p10 = scmp.ge.s32.totalorder %s1223_s25, 2  ;;  %s608_s11 = sand.u32 1, %s1171_s12  }
 0x18b   : > { %p1714_p8 = scmp.ne.s32.totalorder %s1702_s30, 0  ;;  %s609_s24 = scalar_lea.sflag [#allocation5], %s608_s11 }
 0x18d   : > { %p890_p11 = pnand %p894_p10, %p1714_p8 }
 0x18f   : > { %1166 = dma.done.wait (!%p890_p11), %s609_s24, 2048  }
 0x190   : > { %1168 = vsyncadd (!%p890_p11), %s609_s24, 4294965248  ;;  %s22_s25 = sadd.s32 1, %s1223_s25   ;;  %s1716_s18 = sld [smem:[#allocation16_spill]] }
 0x191   : > { %p1616_p2 = scmp.ge.s32.totalorder %s22_s25, 6   ;;  %s1717_s22 = sld [smem:[#allocation13_spill]] }
 0x192   : > { %s1718_s30 = sld [smem:[#allocation14_spill]]  ;;  %s1719_s24 = sld [smem:[#allocation15_spill]] }
 0x193   : > { %s1720_s12 = smov %s1175_s13  ;;  %s1721_s13 = smov %s1179_s14 }
 0x194   : > { %s1722_s14 = smov %s1448_s3  ;;  %s1723_s15 = smov %s1187_s16 }
 0x195   : > { %s1724_s16 = smov %s1191_s17  ;;  %s1729_s21 = smov %s1215_s23 }
 0x196   : > { %s1725_s17 = smov %s1716_s18  ;;  %s1726_s18 = smov %s1199_s19 }
 0x197   : > { %s1727_s19 = smov %s1203_s20  ;;  %s1728_s20 = smov %s1445_s6 }
 0x198   : > { %s1730_s23 = smov %s1718_s30  ;;  %21 = sbr.rel (!%p1616_p2) target bundleno = 16 (0x10), region = 101 }
 0x19f   :  { %614 = vsyncpa [#allocation4], 1 }
 0x1a0   :  { %616 = vsyncpa [#allocation4 + $0x1], 1 }
 0x1a1   :  { %617 = vsyncpa [#allocation7], 1 }
 0x1a2   :  { %619 = vsyncpa [#allocation7 + $0x1], 1 }
 0x1a3   :  { %620 = vsyncpa [#allocation5], 1 }
 0x1a4   :  { %622 = vsyncpa [#allocation5 + $0x1], 1 }

</bundles_post_ra>
